<compile_context>
chip_gen: v7x
topology: tpu7x:2x2x1
jax: 0.10.0
libtpu: 0.0.40
codegen_flags: <defaults>
</compile_context>

<pallas_src>
import functools

import jax
import jax.numpy as jnp
from jax.experimental import pallas as pl
from jax.experimental.pallas import tpu as pltpu


def _round_up(x: int, m: int) -> int:
    return ((x + m - 1) // m) * m


def mlp_kernel(x_ref, w1_ref, b1_ref, w2_ref, b2_ref, o_ref):
    # featurizer: Linear(in -> mid); bf16 operands, f32 accumulation.
    f = jnp.dot(x_ref[...], w1_ref[...],
                preferred_element_type=jnp.float32) + b1_ref[...]
    # dense: Linear(mid -> out). Cast the f32 intermediate back to bf16 for the
    # MXU; bias added once after the full accumulation.
    v = jnp.dot(f.astype(w2_ref.dtype), w2_ref[...],
                preferred_element_type=jnp.float32) + b2_ref[...]
    o_ref[...] = v.astype(o_ref.dtype)
    # TODO(synk): if mid_features grows large (>~2k), add a K-reduction grid
    # axis with an f32 VMEM accumulator instead of holding the full (TB, mid)
    # intermediate in vregs.


@functools.partial(jax.jit, static_argnames=("block_b",))
def mlp_forward(x, w1, b1, w2, b2, *, block_b: int = 128):
    B, in_f = x.shape
    mid_f = w1.shape[1]
    out_f = w2.shape[1]

    # MXU / vreg-friendly padded sizes: lane dims -> multiple of 128,
    # batch tile -> multiple of 16 (bf16 sublane packing).
    in_p = _round_up(in_f, 128)
    mid_p = _round_up(mid_f, 128)
    out_p = _round_up(out_f, 128)
    tb = min(block_b, _round_up(B, 16))
    b_p = _round_up(B, tb)

    xp = jnp.pad(x, ((0, b_p - B), (0, in_p - in_f))).astype(jnp.bfloat16)
    w1p = jnp.pad(w1, ((0, in_p - in_f), (0, mid_p - mid_f))).astype(jnp.bfloat16)
    w2p = jnp.pad(w2, ((0, mid_p - mid_f), (0, out_p - out_f))).astype(jnp.bfloat16)
    b1p = jnp.pad(b1.reshape(1, -1),
                  ((0, 0), (0, mid_p - mid_f))).astype(jnp.float32)
    b2p = jnp.pad(b2.reshape(1, -1),
                  ((0, 0), (0, out_p - out_f))).astype(jnp.float32)

    grid = (b_p // tb,)

    flops = 2 * b_p * (in_p * mid_p + mid_p * out_p)
    bytes_accessed = (xp.size * 2 + w1p.size * 2 + w2p.size * 2
                      + b1p.size * 4 + b2p.size * 4 + b_p * out_p * 4)

    out_padded = pl.pallas_call(
        mlp_kernel,
        out_shape=jax.ShapeDtypeStruct((b_p, out_p), jnp.float32),
        grid_spec=pltpu.PrefetchScalarGridSpec(
            num_scalar_prefetch=0,
            grid=grid,
            in_specs=[
                # x tile marches over the batch.
                pl.BlockSpec((tb, in_p), lambda i: (i, 0)),
                # Weights / biases: same block every step -> VMEM-resident.
                pl.BlockSpec((in_p, mid_p), lambda i: (0, 0)),
                pl.BlockSpec((1, mid_p), lambda i: (0, 0)),
                pl.BlockSpec((mid_p, out_p), lambda i: (0, 0)),
                pl.BlockSpec((1, out_p), lambda i: (0, 0)),
            ],
            out_specs=pl.BlockSpec((tb, out_p), lambda i: (i, 0)),
        ),
        compiler_params=pltpu.CompilerParams(
            dimension_semantics=("parallel",),
        ),
        cost_estimate=pl.CostEstimate(
            flops=flops, transcendentals=0, bytes_accessed=bytes_accessed),
    )(xp, w1p, b1p, w2p, b2p)

    # Strip batch/feature padding.
    return out_padded[:B, :out_f]


def init_params(key, in_features, mid_features, out_features):
    # Deterministic init mimicking nn.Linear defaults:
    # U(-1/sqrt(fan_in), 1/sqrt(fan_in)) for both weight and bias.
    k1, k2, k3, k4 = jax.random.split(key, 4)
    bound1 = 1.0 / jnp.sqrt(in_features)
    bound2 = 1.0 / jnp.sqrt(mid_features)
    # Weights stored already transposed: (fan_in, fan_out).
    w1 = jax.random.uniform(k1, (in_features, mid_features),
                            jnp.float32, -bound1, bound1)
    b1 = jax.random.uniform(k2, (1, mid_features), jnp.float32, -bound1, bound1)
    w2 = jax.random.uniform(k3, (mid_features, out_features),
                            jnp.float32, -bound2, bound2)
    b2 = jax.random.uniform(k4, (1, out_features), jnp.float32, -bound2, bound2)
    return w1, b1, w2, b2


if __name__ == "__main__":
    key = jax.random.PRNGKey(0)
    in_features, mid_features, out_features = 16, 32, 8
    batch = 8

    kx, kp = jax.random.split(key)
    x = jax.random.normal(kx, (batch, in_features), jnp.float32)
    w1, b1, w2, b2 = init_params(kp, in_features, mid_features, out_features)

    out = mlp_forward(x, w1, b1, w2, b2)
    jax.block_until_ready(out)

    # Reference in plain f32 JAX (same semantics as the torch Linear stack).
    # bf16 MXU operands -> bf16-appropriate tolerance.
    ref = (x @ w1 + b1) @ w2 + b2
    assert out.shape == (batch, out_features)
    assert jnp.allclose(out, ref, atol=3e-2, rtol=3e-2), (
        float(jnp.max(jnp.abs(out - ref))))

    print("KERNEL_OK")
</pallas_src>

<mosaic_0001>
module attributes {stable_mosaic.version = 11 : i64} {
  func.func @mlp_kernel(%arg0: i32, %arg1: memref<16x128xbf16, #tpu.memory_space<vmem>>, %arg2: memref<128x128xbf16, #tpu.memory_space<vmem>>, %arg3: memref<1x128xf32, #tpu.memory_space<vmem>>, %arg4: memref<128x128xbf16, #tpu.memory_space<vmem>>, %arg5: memref<1x128xf32, #tpu.memory_space<vmem>>, %arg6: memref<16x128xf32, #tpu.memory_space<vmem>>) attributes {dimension_semantics = [#tpu.dimension_semantics<parallel>], iteration_bounds = array<i64: 1>, scalar_prefetch = 0 : i64, scratch_operands = 0 : i64, tpu.core_type = #tpu.core_type<tc>, window_params = [{transform_indices = @transform_0, window_bounds = array<i64: 16, 128>}, {pipeline_mode = #tpu.pipeline_mode<synchronous>, transform_indices = @transform_1, window_bounds = array<i64: 128, 128>}, {pipeline_mode = #tpu.pipeline_mode<synchronous>, transform_indices = @transform_2, window_bounds = array<i64: 1, 128>}, {pipeline_mode = #tpu.pipeline_mode<synchronous>, transform_indices = @transform_3, window_bounds = array<i64: 128, 128>}, {pipeline_mode = #tpu.pipeline_mode<synchronous>, transform_indices = @transform_4, window_bounds = array<i64: 1, 128>}, {transform_indices = @transform_5, window_bounds = array<i64: 16, 128>}]} {
    %c0 = arith.constant 0 : index
    %c0_0 = arith.constant 0 : index
    %0 = vector.load %arg1[%c0, %c0_0] : memref<16x128xbf16, #tpu.memory_space<vmem>>, vector<16x128xbf16>
    %c0_1 = arith.constant 0 : index
    %c0_2 = arith.constant 0 : index
    %1 = vector.load %arg2[%c0_1, %c0_2] : memref<128x128xbf16, #tpu.memory_space<vmem>>, vector<128x128xbf16>
    %cst = arith.constant dense<0.000000e+00> : vector<16x128xf32>
    %2 = tpu.matmul %0, %1, %cst {dimension_numbers = #tpu.dot_dimension_numbers<[1], [0], [0], [1], [0, 0, 1, 1], [], []>} : vector<16x128xbf16>, vector<128x128xbf16>, vector<16x128xf32> -> vector<16x128xf32>
    %c0_3 = arith.constant 0 : index
    %c0_4 = arith.constant 0 : index
    %3 = vector.load %arg3[%c0_3, %c0_4] : memref<1x128xf32, #tpu.memory_space<vmem>>, vector<1x128xf32>
    %4 = vector.broadcast %3 : vector<1x128xf32> to vector<16x128xf32>
    %5 = arith.addf %2, %4 : vector<16x128xf32>
    %6 = arith.truncf %5 : vector<16x128xf32> to vector<16x128xbf16>
    %c0_5 = arith.constant 0 : index
    %c0_6 = arith.constant 0 : index
    %7 = vector.load %arg4[%c0_5, %c0_6] : memref<128x128xbf16, #tpu.memory_space<vmem>>, vector<128x128xbf16>
    %cst_7 = arith.constant dense<0.000000e+00> : vector<16x128xf32>
    %8 = tpu.matmul %6, %7, %cst_7 {dimension_numbers = #tpu.dot_dimension_numbers<[1], [0], [0], [1], [0, 0, 1, 1], [], []>} : vector<16x128xbf16>, vector<128x128xbf16>, vector<16x128xf32> -> vector<16x128xf32>
    %c0_8 = arith.constant 0 : index
    %c0_9 = arith.constant 0 : index
    %9 = vector.load %arg5[%c0_8, %c0_9] : memref<1x128xf32, #tpu.memory_space<vmem>>, vector<1x128xf32>
    %10 = vector.broadcast %9 : vector<1x128xf32> to vector<16x128xf32>
    %11 = arith.addf %8, %10 : vector<16x128xf32>
    %c0_10 = arith.constant 0 : index
    %c0_11 = arith.constant 0 : index
    %12 = vector.load %arg6[%c0_10, %c0_11] : memref<16x128xf32, #tpu.memory_space<vmem>>, vector<16x128xf32>
    tpu.vector_store %arg6[%c0_10, %c0_11], %11 {strides = array<i32>} : memref<16x128xf32, #tpu.memory_space<vmem>>, vector<16x128xf32>,
    return
  }
  func.func @transform_0(%arg0: i32) -> (i32, i32) {
    %c0_i32 = arith.constant 0 : i32
    %c0_i32_0 = arith.constant 0 : i32
    return %arg0, %c0_i32 : i32, i32
  }
  func.func @transform_1(%arg0: i32) -> (i32, i32) {
    %c0_i32 = arith.constant 0 : i32
    %c0_i32_0 = arith.constant 0 : i32
    %c0_i32_1 = arith.constant 0 : i32
    return %c0_i32, %c0_i32_0 : i32, i32
  }
  func.func @transform_2(%arg0: i32) -> (i32, i32) {
    %c0_i32 = arith.constant 0 : i32
    %c0_i32_0 = arith.constant 0 : i32
    %c0_i32_1 = arith.constant 0 : i32
    return %c0_i32, %c0_i32_0 : i32, i32
  }
  func.func @transform_3(%arg0: i32) -> (i32, i32) {
    %c0_i32 = arith.constant 0 : i32
    %c0_i32_0 = arith.constant 0 : i32
    %c0_i32_1 = arith.constant 0 : i32
    return %c0_i32, %c0_i32_0 : i32, i32
  }
  func.func @transform_4(%arg0: i32) -> (i32, i32) {
    %c0_i32 = arith.constant 0 : i32
    %c0_i32_0 = arith.constant 0 : i32
    %c0_i32_1 = arith.constant 0 : i32
    return %c0_i32, %c0_i32_0 : i32, i32
  }
  func.func @transform_5(%arg0: i32) -> (i32, i32) {
    %c0_i32 = arith.constant 0 : i32
    %c0_i32_0 = arith.constant 0 : i32
    return %arg0, %c0_i32 : i32, i32
  }
}

</mosaic_0001>

<bundles_post_ra>
// kernel: mlp_forward.1
= control target key start
LH: loop header
LB: loop body
LE: loop exit
PB: predicated region body
PF: predicated region fallthrough
CT: control target
= control target key end

     0   :  { %v356_v0 = vmov 0.0   ;;  %vm357_vm0 = vmmov 0   ;;  %s451_s1 = inlined_call_operand.vmem [shape: bf16[128,128], index: 1, kind: input, shape index: {}]   ;;  %s452_s3 = inlined_call_operand.vmem [shape: bf16[128,128], index: 3, kind: input, shape index: {}]   ;;  %s453_s0 = inlined_call_operand.vmem [shape: bf16[16,128], index: 0, kind: input, shape index: {}]   ;;  %s454_s2 = inlined_call_operand.vmem [shape: f32[1,128], index: 2, kind: input, shape index: {}]   ;;  %s455_s4 = inlined_call_operand.vmem [shape: f32[1,128], index: 4, kind: input, shape index: {}]   ;;  %s456_s5 = inlined_call_operand.vmem [shape: f32[16,128], index: 5, kind: output, shape index: {}]  }
   0x1   :  { %297 = vmatprep.subr.bf16.mxu0 %v356_v0  ;;  %v339_v1 = vld [vmem:[%s451_s1] sm:$0xff]   ;;  %313 = vmatprep.mubr.msk.bf16.mxu0 %vm357_vm0, %v356_v0  ;;  %v340_v2 = vld [vmem:[%s451_s1 + $0x8] sm:$0xff]   ;;  %v341_v3 = vld [vmem:[%s451_s1 + $0x10] sm:$0xff]  }
   0x2   :  { %317 = vmatprep.subr.bf16.mxu1 %v356_v0  ;;  %333 = vmatprep.mubr.msk.bf16.mxu1 %vm357_vm0, %v356_v0  ;;  %v348_v4 = vld [vmem:[%s452_s3] sm:$0xff]   ;;  %v342_v5 = vld [vmem:[%s451_s1 + $0x18] sm:$0xff]   ;;  %v349_v6 = vld [vmem:[%s452_s3 + $0x8] sm:$0xff]  }
   0x3   :  { %298 = vmatpush3.bf16.msra.mxu0 %v339_v1  ;;  %318 = vmatpush3.bf16.msra.mxu1 %v348_v4  ;;  %v343_v7 = vld [vmem:[%s451_s1 + $0x20] sm:$0xff]   ;;  %v350_v8 = vld [vmem:[%s452_s3 + $0x10] sm:$0xff]   ;;  %v344_v9 = vld [vmem:[%s451_s1 + $0x28] sm:$0xff]  }
   0x4   :  { %299 = vmatprep.subr.bf16.mxu0 %v356_v0  ;;  %319 = vmatprep.subr.bf16.mxu1 %v356_v0  ;;  %v351_v10 = vld [vmem:[%s452_s3 + $0x18] sm:$0xff]   ;;  %v345_v11 = vld [vmem:[%s451_s1 + $0x30] sm:$0xff]   ;;  %v352_v12 = vld [vmem:[%s452_s3 + $0x20] sm:$0xff]  }
   0x5   :  { %v346_v13 = vld [vmem:[%s451_s1 + $0x38] sm:$0xff]   ;;  %v353_v14 = vld [vmem:[%s452_s3 + $0x28] sm:$0xff]   ;;  %v347_v15 = vld [vmem:[%s453_s0] sm:$0xff]  }
   0x6   :  { %v354_v16 = vld [vmem:[%s452_s3 + $0x30] sm:$0xff]   ;;  %v355_v17 = vld [vmem:[%s452_s3 + $0x38] sm:$0xff]   ;;  %v260_v18 = vld [vmem:[%s454_s2] ss:$0 sm:$0xff] }
   0x7   :  { %300 = vmatpush3.bf16.msra.mxu0 %v340_v2  ;;  %320 = vmatpush3.bf16.msra.mxu1 %v349_v6  ;;  %v270_v26 = vld [vmem:[%s455_s4] ss:$0 sm:$0xff] }
   0x8   :  { %301 = vmatprep.subr.bf16.mxu0 %v356_v0  ;;  %321 = vmatprep.subr.bf16.mxu1 %v356_v0 }
   0xb   :  { %302 = vmatpush3.bf16.msra.mxu0 %v341_v3  ;;  %322 = vmatpush3.bf16.msra.mxu1 %v350_v8 }
   0xc   :  { %303 = vmatprep.subr.bf16.mxu0 %v356_v0  ;;  %323 = vmatprep.subr.bf16.mxu1 %v356_v0 }
   0xf   :  { %304 = vmatpush3.bf16.msra.mxu0 %v342_v5  ;;  %324 = vmatpush3.bf16.msra.mxu1 %v351_v10 }
  0x10   :  { %305 = vmatprep.subr.bf16.mxu0 %v356_v0  ;;  %325 = vmatprep.subr.bf16.mxu1 %v356_v0 }
  0x13   :  { %306 = vmatpush3.bf16.msra.mxu0 %v343_v7  ;;  %326 = vmatpush3.bf16.msra.mxu1 %v352_v12 }
  0x14   :  { %307 = vmatprep.subr.bf16.mxu0 %v356_v0  ;;  %327 = vmatprep.subr.bf16.mxu1 %v356_v0 }
  0x17   :  { %308 = vmatpush3.bf16.msra.mxu0 %v344_v9  ;;  %328 = vmatpush3.bf16.msra.mxu1 %v353_v14 }
  0x18   :  { %309 = vmatprep.subr.bf16.mxu0 %v356_v0  ;;  %329 = vmatprep.subr.bf16.mxu1 %v356_v0 }
  0x1b   :  { %310 = vmatpush3.bf16.msra.mxu0 %v345_v11  ;;  %330 = vmatpush3.bf16.msra.mxu1 %v354_v16 }
  0x1c   :  { %311 = vmatprep.subr.bf16.mxu0 %v356_v0  ;;  %331 = vmatprep.subr.bf16.mxu1 %v356_v0 }
  0x1f   :  { %312 = vmatpush3.bf16.msra.mxu0 %v346_v13  ;;  %332 = vmatpush3.bf16.msra.mxu1 %v355_v17 }
  0x22   :  { %314 = vmatmul.mubr.bf16.vlgmr.msra.gmra.mrb[0].mxu0 %v347_v15 }
  0xf5   :  { %v134_v19 = vpop.f32.mrb[0].mxu0 }
  0xf6   :  { %v315_v20 = vpop.f32.mrb[1].mxu0  ;;  %v135_v22 = vadd.f32 %v260_v18, %v134_v19 }
  0xf7   :  { %v137_v21 = vpop.f32.mrb[2].mxu0 }
  0xf8   :  { %v138_v23 = vadd.f32 %v260_v18, %v137_v21  ;;  %v316_v24 = vpop.f32.mrb[3].mxu0 }
  0xfa   :  { %v141_v25 = vpack.c.bf16 %v138_v23, %v135_v22 }
  0xfc   :  { %334 = vmatmul.mubr.bf16.vlgmr.msra.gmra.mrb[0].mxu1 %v141_v25 }
 0x1cf   :  { %v247_v27 = vpop.f32.mrb[0].mxu1 }
 0x1d0   :  { %v248_v28 = vadd.f32 %v270_v26, %v247_v27  ;;  %v335_v29 = vpop.f32.mrb[1].mxu1 }
 0x1d1   :  { %v250_v30 = vpop.f32.mrb[2].mxu1 }
 0x1d2   :  { %254 = vst [vmem:[%s456_s5] sm:$0xff] %v248_v28  ;;  %v251_v31 = vadd.f32 %v270_v26, %v250_v30  ;;  %v336_v32 = vpop.f32.mrb[3].mxu1 }
 0x1d4   :  { %255 = vst [vmem:[%s456_s5 + $0x8] sm:$0xff] %v251_v31 }

</bundles_post_ra>
